<compile_context>
chip_gen: v7x
topology: tpu7x:2x2x1
jax: 0.10.0
libtpu: 0.0.40
codegen_flags: <defaults>
</compile_context>

<pallas_src>
import jax
import jax.numpy as jnp
from jax.experimental import pallas as pl
from jax.experimental.pallas import tpu as pltpu


def _round_up(n, m):
    return ((n + m - 1) // m) * m


def autoencoder_kernel(x_ref, wenc_ref, wdec_ref, out_ref):
    # x_ref:    (tb, D)   batch tile
    # wenc_ref: (D, Hp)   encoder weight, pre-transposed, grid-invariant
    # wdec_ref: (Hp, D)   decoder weight, pre-transposed, grid-invariant
    x = x_ref[...]
    # encoded = x @ enc_weights.T  ->  (tb, Hp): plain (M,K)@(K,N) on the MXU.
    encoded = jnp.dot(x, wenc_ref[...], preferred_element_type=jnp.float32)
    # Feed the second MXU pass in the operand dtype (no-op for f32 weights).
    encoded = encoded.astype(wdec_ref.dtype)
    # recon = encoded @ dec_weights.T  ->  (tb, D)
    recon = jnp.dot(encoded, wdec_ref[...], preferred_element_type=jnp.float32)
    out_ref[...] = recon.astype(out_ref.dtype)


def prepare_weights(enc_weights, dec_weights, *, compute_dtype=None):
    """One-time weight layout prep; hoist this out of the per-call serving path.

    enc_weights: (H, D) nn.Linear layout (out_features, in_features)
    dec_weights: (D, H)
    Returns (wenc_t, wdec_t): (D, Hp) and (Hp, D), Hp = round_up(H, 128),
    zero-padded along the hidden dim (inert for the matmul chain).
    """
    H, D = enc_weights.shape
    assert dec_weights.shape == (D, H), "decoder weight must be (input_shape, h)"
    dtype = enc_weights.dtype if compute_dtype is None else jnp.dtype(compute_dtype)
    Hp = _round_up(H, 128)
    wenc_t = jnp.zeros((D, Hp), dtype).at[:, :H].set(enc_weights.T.astype(dtype))
    wdec_t = jnp.zeros((Hp, D), dtype).at[:H, :].set(dec_weights.T.astype(dtype))
    return wenc_t, wdec_t


def autoencoder_untied_prepared(x, wenc_t, wdec_t, *, tb=None, out_dtype=None):
    """Forward pass with pre-laid-out weights from prepare_weights()."""
    B, D = x.shape
    D2, Hp = wenc_t.shape
    assert D == D2 and wdec_t.shape == (Hp, D), "weight layout mismatch"
    out_dtype = x.dtype if out_dtype is None else jnp.dtype(out_dtype)

    xc = x if x.dtype == wenc_t.dtype else x.astype(wenc_t.dtype)

    if tb is None:
        # Single grid step whenever the batch fits: per-step overhead dwarfs
        # the MXU time at these sizes on every generation.  Cap the tile so
        # the double-buffered x/out tiles stay well under the scoped-VMEM
        # default (16/32/32 MiB on v5e/v6e/v7x); huge batches then split and
        # the "parallel" batch axis lets v7x's two TensorCores share the work.
        itemsize = max(jnp.dtype(xc.dtype).itemsize, jnp.dtype(out_dtype).itemsize)
        row_bytes = 4 * D * itemsize  # 2 buffers x (x tile row + out tile row)
        max_tb = max(8, ((8 << 20) // max(row_bytes, 1)) // 8 * 8)
        tb = min(_round_up(B, 8), max_tb)
    tb = max(8, _round_up(tb, 8))

    grid = (pl.cdiv(B, tb),)

    return pl.pallas_call(
        autoencoder_kernel,
        out_shape=jax.ShapeDtypeStruct((B, D), out_dtype),
        grid_spec=pltpu.PrefetchScalarGridSpec(
            num_scalar_prefetch=0,
            grid=grid,
            in_specs=[
                pl.BlockSpec((tb, D), lambda i: (i, 0)),    # batch tile (ragged tail OK)
                pl.BlockSpec((D, Hp), lambda i: (0, 0)),    # enc^T, grid-invariant
                pl.BlockSpec((Hp, D), lambda i: (0, 0)),    # dec^T, grid-invariant
            ],
            out_specs=pl.BlockSpec((tb, D), lambda i: (i, 0)),
        ),
        compiler_params=pltpu.CompilerParams(
            dimension_semantics=("parallel",),
        ),
    )(xc, wenc_t, wdec_t)


def autoencoder_untied(x, enc_weights, dec_weights, *, compute_dtype=None,
                       tb=None, out_dtype=None):
    """Convenience wrapper: prep weights then run (for serving, call
    prepare_weights once and reuse autoencoder_untied_prepared)."""
    wenc_t, wdec_t = prepare_weights(enc_weights, dec_weights,
                                     compute_dtype=compute_dtype)
    return autoencoder_untied_prepared(x, wenc_t, wdec_t, tb=tb,
                                       out_dtype=out_dtype or x.dtype)


if __name__ == "__main__":
    # Small shapes consistent with the module: flat feature vectors, hidden h=50.
    B = 8
    input_shape = 128
    h = 50

    key = jax.random.PRNGKey(0)
    kx, ke, kd = jax.random.split(key, 3)
    x = jax.random.normal(kx, (B, input_shape), dtype=jnp.float32)
    # nn.Linear layout: (out_features, in_features).
    enc_weights = jax.random.normal(ke, (h, input_shape), dtype=jnp.float32) * 0.05
    dec_weights = jax.random.normal(kd, (input_shape, h), dtype=jnp.float32) * 0.05

    ref = (x @ enc_weights.T) @ dec_weights.T

    # One-time (hoisted) weight prep, reused across calls.
    wenc_t, wdec_t = prepare_weights(enc_weights, dec_weights)

    # f32 path: exact check against the pure-JAX reference.
    out = jax.block_until_ready(autoencoder_untied_prepared(x, wenc_t, wdec_t))
    assert out.shape == (B, input_shape)
    assert jnp.allclose(out, ref, atol=1e-4, rtol=1e-4)

    # Ragged batch (not a multiple of 8): cdiv grid + masked trailing block,
    # no explicit zero-pad copy of x in the wrapper.
    Br = 13
    xr = jax.random.normal(kd, (Br, input_shape), dtype=jnp.float32)
    ref_r = (xr @ enc_weights.T) @ dec_weights.T
    out_r = jax.block_until_ready(autoencoder_untied_prepared(xr, wenc_t, wdec_t))
    assert out_r.shape == (Br, input_shape)
    assert jnp.allclose(out_r, ref_r, atol=1e-4, rtol=1e-4)

    # bf16-operand path (f32 accumulation): halves operand HBM bytes; the
    # intermediate `encoded` is also bf16, so tolerance is looser vs. f32 ref.
    wenc_b, wdec_b = prepare_weights(enc_weights, dec_weights,
                                     compute_dtype=jnp.bfloat16)
    out_b = jax.block_until_ready(
        autoencoder_untied_prepared(x, wenc_b, wdec_b, out_dtype=jnp.float32))
    assert out_b.shape == (B, input_shape)
    assert jnp.allclose(out_b, ref, atol=5e-2, rtol=5e-2)

    print("KERNEL_OK")
</pallas_src>

<mosaic_0001>
module attributes {stable_mosaic.version = 11 : i64} {
  func.func @autoencoder_kernel(%arg0: i32, %arg1: memref<8x128xf32, #tpu.memory_space<vmem>>, %arg2: memref<128x128xf32, #tpu.memory_space<vmem>>, %arg3: memref<128x128xf32, #tpu.memory_space<vmem>>, %arg4: memref<8x128xf32, #tpu.memory_space<vmem>>) attributes {dimension_semantics = [#tpu.dimension_semantics<parallel>], iteration_bounds = array<i64: 1>, scalar_prefetch = 0 : i64, scratch_operands = 0 : i64, tpu.core_type = #tpu.core_type<tc>, window_params = [{transform_indices = @transform_0, window_bounds = array<i64: 8, 128>}, {pipeline_mode = #tpu.pipeline_mode<synchronous>, transform_indices = @transform_1, window_bounds = array<i64: 128, 128>}, {pipeline_mode = #tpu.pipeline_mode<synchronous>, transform_indices = @transform_2, window_bounds = array<i64: 128, 128>}, {transform_indices = @transform_3, window_bounds = array<i64: 8, 128>}]} {
    %c0 = arith.constant 0 : index
    %c0_0 = arith.constant 0 : index
    %0 = vector.load %arg1[%c0, %c0_0] : memref<8x128xf32, #tpu.memory_space<vmem>>, vector<8x128xf32>
    %c0_1 = arith.constant 0 : index
    %c0_2 = arith.constant 0 : index
    %1 = vector.load %arg2[%c0_1, %c0_2] : memref<128x128xf32, #tpu.memory_space<vmem>>, vector<128x128xf32>
    %cst = arith.constant dense<0.000000e+00> : vector<8x128xf32>
    %2 = tpu.matmul %0, %1, %cst {dimension_numbers = #tpu.dot_dimension_numbers<[1], [0], [0], [1], [0, 0, 1, 1], [], []>} : vector<8x128xf32>, vector<128x128xf32>, vector<8x128xf32> -> vector<8x128xf32>
    %c0_3 = arith.constant 0 : index
    %c0_4 = arith.constant 0 : index
    %3 = vector.load %arg3[%c0_3, %c0_4] : memref<128x128xf32, #tpu.memory_space<vmem>>, vector<128x128xf32>
    %cst_5 = arith.constant dense<0.000000e+00> : vector<8x128xf32>
    %4 = tpu.matmul %2, %3, %cst_5 {dimension_numbers = #tpu.dot_dimension_numbers<[1], [0], [0], [1], [0, 0, 1, 1], [], []>} : vector<8x128xf32>, vector<128x128xf32>, vector<8x128xf32> -> vector<8x128xf32>
    %c0_6 = arith.constant 0 : index
    %c0_7 = arith.constant 0 : index
    %5 = vector.load %arg4[%c0_6, %c0_7] : memref<8x128xf32, #tpu.memory_space<vmem>>, vector<8x128xf32>
    tpu.vector_store %arg4[%c0_6, %c0_7], %4 {strides = array<i32>} : memref<8x128xf32, #tpu.memory_space<vmem>>, vector<8x128xf32>,
    return
  }
  func.func @transform_0(%arg0: i32) -> (i32, i32) {
    %c0_i32 = arith.constant 0 : i32
    %c0_i32_0 = arith.constant 0 : i32
    return %arg0, %c0_i32 : i32, i32
  }
  func.func @transform_1(%arg0: i32) -> (i32, i32) {
    %c0_i32 = arith.constant 0 : i32
    %c0_i32_0 = arith.constant 0 : i32
    %c0_i32_1 = arith.constant 0 : i32
    return %c0_i32, %c0_i32_0 : i32, i32
  }
  func.func @transform_2(%arg0: i32) -> (i32, i32) {
    %c0_i32 = arith.constant 0 : i32
    %c0_i32_0 = arith.constant 0 : i32
    %c0_i32_1 = arith.constant 0 : i32
    return %c0_i32, %c0_i32_0 : i32, i32
  }
  func.func @transform_3(%arg0: i32) -> (i32, i32) {
    %c0_i32 = arith.constant 0 : i32
    %c0_i32_0 = arith.constant 0 : i32
    return %arg0, %c0_i32 : i32, i32
  }
}

</mosaic_0001>

<bundles_post_ra>
// kernel: tpu_custom_call.1
= control target key start
LH: loop header
LB: loop body
LE: loop exit
PB: predicated region body
PF: predicated region fallthrough
CT: control target
= control target key end

     0   :  { %8 = vsyncpa [#allocation3], 0  ;;  %s598_s0 = inlined_call_operand.hbm [shape: f32[8,128], index: 0, kind: input, shape index: {}]   ;;  %s599_s1 = inlined_call_operand.hbm [shape: f32[128,128], index: 1, kind: input, shape index: {}]   ;;  %s600_s2 = inlined_call_operand.hbm [shape: f32[128,128], index: 2, kind: input, shape index: {}]   ;;  %s601_s3 = inlined_call_operand.hbm [shape: f32[8,128], index: 3, kind: output, shape index: {}]  }
   0x1   :  { %9 = vsyncpa [#allocation6], 0 }
   0x2   :  { %10 = vsyncpa [#allocation4], 0  ;;  %s499_s12 = smov [#allocation5]   ;;  %s405_s16 = scalar_lea.hbm %s599_s1, 2048 }
   0x3   :  { %s26_s13 = sshll.u32 %s499_s12, 4  ;;  %p406_p0 = scmp.ne.s32.totalorder %s599_s1, %s405_s16  ;;  %s27_s13 = int_to_ptr.vmem [resolvable:$true] %s26_s13 }
   0x4   :  { %p409_p1 = scmp.lt.u32.totalorder %s405_s16, %s599_s1 }
   0x6   :  { %p411_p2 = pnand %p409_p1, %p406_p0 }
   0x8   :  { %414 = shalt.err (!%p411_p2)
}
   0x9   :  { %s415_s21 = scalar_lea.vmem %s27_s13, 2048  ;;  %p420_p4 = scmp.lt.s32.totalorder %s27_s13, %s27_s13 }
   0xa   :  { %p416_p3 = scmp.ne.s32.totalorder %s27_s13, %s415_s21  ;;  %p421_p5 = scmp.lt.s32.totalorder %s415_s21, %s415_s21 }
   0xc   :  { %p422_p6 = por %p421_p5, %p420_p4 }
   0xe   :  { %p423_p7 = pnand %p422_p6, %p416_p3 }
  0x10   :  { %426 = shalt.err (!%p423_p7)
}
  0x11   :  { %s500_s22 = smov 128   ;;  %s501_s23 = smov 8  }
  0x12   :  { %32 = dma.hbm_to_vmem [thread:$0]  %s599_s1, 2048, %s27_s13, [#allocation6], %s500_s22, %s500_s22, %s501_s23  }
  0x13   :  { %s502_s26 = smov [#allocation2]   ;;  %s503_s28 = smov [#allocation7]  }
  0x14   :  { %s17_s27 = sshll.u32 %s502_s26, 4  ;;  %s38_s29 = sshll.u32 %s503_s28, 4  ;;  %s18_s27 = int_to_ptr.vmem [resolvable:$true] %s17_s27  ;;  %s39_s29 = int_to_ptr.vmem [resolvable:$true] %s38_s29 }
  0x15   :  { %s427_s5 = scalar_lea.hbm %s598_s0, 128 }
  0x16   :  { %p428_p8 = scmp.ne.s32.totalorder %s598_s0, %s427_s5  ;;  %p431_p9 = scmp.lt.u32.totalorder %s427_s5, %s598_s0 }
  0x18   :  { %p433_p10 = pnand %p431_p9, %p428_p8 }
  0x1a   :  { %436 = shalt.err (!%p433_p10)
}
  0x1b   :  { %s437_s1 = scalar_lea.vmem %s18_s27, 128  ;;  %p442_p12 = scmp.lt.s32.totalorder %s18_s27, %s18_s27 }
  0x1c   :  { %p438_p11 = scmp.ne.s32.totalorder %s18_s27, %s437_s1  ;;  %p443_p13 = scmp.lt.s32.totalorder %s437_s1, %s437_s1 }
  0x1e   :  { %p444_p0 = por %p443_p13, %p442_p12 }
  0x20   :  { %p445_p1 = pnand %p444_p0, %p438_p11 }
  0x22   :  { %448 = shalt.err (!%p445_p1)
}
  0x23   :  { %20 = dma.hbm_to_vmem [thread:$0]  %s598_s0, 128, %s18_s27, [#allocation3]  }
  0x24   :  { %s449_s14 = scalar_lea.hbm %s600_s2, 2048 }
  0x25   :  { %p450_p2 = scmp.ne.s32.totalorder %s600_s2, %s449_s14  ;;  %p453_p3 = scmp.lt.u32.totalorder %s449_s14, %s600_s2 }
  0x27   :  { %p455_p4 = pnand %p453_p3, %p450_p2 }
  0x29   :  { %458 = shalt.err (!%p455_p4)
}
  0x2a   :  { %s459_s19 = scalar_lea.vmem %s39_s29, 2048  ;;  %p464_p6 = scmp.lt.s32.totalorder %s39_s29, %s39_s29 }
  0x2b   :  { %p460_p5 = scmp.ne.s32.totalorder %s39_s29, %s459_s19  ;;  %p465_p7 = scmp.lt.s32.totalorder %s459_s19, %s459_s19 }
  0x2d   :  { %p466_p8 = por %p465_p7, %p464_p6 }
  0x2f   :  { %p467_p9 = pnand %p466_p8, %p460_p5 }
  0x31   :  { %470 = shalt.err (!%p467_p9)
}
  0x32   :  { %44 = dma.hbm_to_vmem [thread:$0]  %s600_s2, 2048, %s39_s29, [#allocation6], %s500_s22, %s500_s22, %s501_s23  }
  0x33   :  { %493 = dma.done.wait [#allocation3], 128  }
  0x34   :  { %494 = vsyncadd [#allocation3], 4294967168 }
  0x35   :  { %495 = dma.done.wait [#allocation6], 4096  }
  0x36   :  { %496 = vsyncadd [#allocation6], 4294963200  ;;  %v504_v0 = vmov 0.0|0.0   ;;  %vm505_vm0 = vmmov 0   ;;  %v506_v1 = vmov 0.0   ;;  %v55_v2 = vld [vmem:[#allocation5] sm:$0xff] }
  0x37   :  { %348 = vmatprep.subr.bf16.mxu0 %v504_v0  ;;  %310 = vmatprep.mubr.msk.f32.mxu0 %vm505_vm0, %v506_v1  ;;  %v56_v3 = vld [vmem:[#allocation5 + $0x8] sm:$0xff]  ;;  %v57_v4 = vld [vmem:[#allocation5 + $0x10] sm:$0xff]  ;;  %v58_v6 = vld [vmem:[#allocation5 + $0x18] sm:$0xff]  ;;  %s507_s2 = smov [#allocation8]  }
  0x38   :  { %372 = vmatprep.subr.bf16.mxu1 %v504_v0  ;;  %345 = vmatprep.mubr.msk.f32.mxu1 %vm505_vm0, %v506_v1  ;;  %v349_v5 = vpack.c.bf16 %v56_v3, %v55_v2  ;;  %v352_v7 = vpack.c.bf16 %v58_v6, %v57_v4  ;;  %v59_v8 = vld [vmem:[#allocation5 + $0x20] sm:$0xff]  ;;  %v60_v9 = vld [vmem:[#allocation5 + $0x28] sm:$0xff]  ;;  %v143_v12 = vld [vmem:[#allocation7 + $0x10] sm:$0xff]  ;;  %s234_s21 = sshll.u32 %s507_s2, 4  ;;  %s235_s21 = int_to_ptr.vmem [resolvable:$true] %s234_s21 }
  0x39   :  { %v141_v10 = vld [vmem:[#allocation7] sm:$0xff]  ;;  %v142_v11 = vld [vmem:[#allocation7 + $0x8] sm:$0xff]  ;;  %v144_v13 = vld [vmem:[#allocation7 + $0x18] sm:$0xff]  ;;  %v355_v14 = vpack.c.bf16 %v60_v9, %v59_v8  ;;  %s471_s22 = scalar_lea.vmem %s235_s21, 128  ;;  %p476_p11 = scmp.lt.s32.totalorder %s235_s21, %s235_s21 }
  0x3a   :  { %350 = vmatpush3.bf16.msra.mxu0 %v349_v5  ;;  %v373_v15 = vpack.c.bf16 %v142_v11, %v141_v10  ;;  %v61_v16 = vld [vmem:[#allocation5 + $0x30] sm:$0xff]  ;;  %v62_v17 = vld [vmem:[#allocation5 + $0x38] sm:$0xff]  ;;  %v376_v18 = vpack.c.bf16 %v144_v13, %v143_v12  ;;  %v145_v19 = vld [vmem:[#allocation7 + $0x20] sm:$0xff]  ;;  %p472_p10 = scmp.ne.s32.totalorder %s235_s21, %s471_s22  ;;  %p477_p12 = scmp.lt.s32.totalorder %s471_s22, %s471_s22 }
  0x3b   :  { %351 = vmatprep.subr.bf16.mxu0 %v504_v0  ;;  %v146_v20 = vld [vmem:[#allocation7 + $0x28] sm:$0xff]  ;;  %v358_v21 = vpack.c.bf16 %v62_v17, %v61_v16  ;;  %v63_v22 = vld [vmem:[#allocation5 + $0x40] sm:$0xff]  ;;  %v147_v25 = vld [vmem:[#allocation7 + $0x30] sm:$0xff] }
  0x3c   :  { %374 = vmatpush3.bf16.msra.mxu1 %v373_v15  ;;  %v64_v23 = vld [vmem:[#allocation5 + $0x48] sm:$0xff]  ;;  %v379_v24 = vpack.c.bf16 %v146_v20, %v145_v19  ;;  %v148_v26 = vld [vmem:[#allocation7 + $0x38] sm:$0xff]  ;;  %v65_v28 = vld [vmem:[#allocation5 + $0x50] sm:$0xff]  ;;  %p478_p13 = por %p477_p12, %p476_p11 }
  0x3d   :  { %375 = vmatprep.subr.bf16.mxu1 %v504_v0  ;;  %v361_v27 = vpack.c.bf16 %v64_v23, %v63_v22  ;;  %v66_v29 = vld [vmem:[#allocation5 + $0x58] sm:$0xff]  ;;  %v382_v30 = vpack.c.bf16 %v148_v26, %v147_v25  ;;  %v149_v31 = vld [vmem:[#allocation7 + $0x40] sm:$0xff]  ;;  %v150_v32 = vld [vmem:[#allocation7 + $0x48] sm:$0xff] }
  0x3e   :  { %353 = vmatpush3.bf16.msra.mxu0 %v352_v7  ;;  %v364_v33 = vpack.c.bf16 %v66_v29, %v65_v28  ;;  %v67_v34 = vld [vmem:[#allocation5 + $0x60] sm:$0xff]  ;;  %v68_v35 = vld [vmem:[#allocation5 + $0x68] sm:$0xff]  ;;  %v385_v36 = vpack.c.bf16 %v150_v32, %v149_v31  ;;  %v151_v37 = vld [vmem:[#allocation7 + $0x50] sm:$0xff]  ;;  %p479_p0 = pnand %p478_p13, %p472_p10 }
  0x3f   :  { %354 = vmatprep.subr.bf16.mxu0 %v504_v0  ;;  %v152_v38 = vld [vmem:[#allocation7 + $0x58] sm:$0xff]  ;;  %v367_v39 = vpack.c.bf16 %v68_v35, %v67_v34  ;;  %v69_v40 = vld [vmem:[#allocation5 + $0x70] sm:$0xff]  ;;  %v153_v43 = vld [vmem:[#allocation7 + $0x60] sm:$0xff] }
  0x40   :  { %377 = vmatpush3.bf16.msra.mxu1 %v376_v18  ;;  %v70_v41 = vld [vmem:[#allocation5 + $0x78] sm:$0xff]  ;;  %v388_v42 = vpack.c.bf16 %v152_v38, %v151_v37  ;;  %v154_v44 = vld [vmem:[#allocation7 + $0x68] sm:$0xff]  ;;  %v155_v47 = vld [vmem:[#allocation7 + $0x70] sm:$0xff] }
  0x41   :  { %378 = vmatprep.subr.bf16.mxu1 %v504_v0  ;;  %v370_v45 = vpack.c.bf16 %v70_v41, %v69_v40  ;;  %v391_v46 = vpack.c.bf16 %v154_v44, %v153_v43  ;;  %v156_v48 = vld [vmem:[#allocation7 + $0x78] sm:$0xff] }
  0x42   :  { %356 = vmatpush3.bf16.msra.mxu0 %v355_v14  ;;  %v54_v49 = vld [vmem:[#allocation2] sm:$0xff]  ;;  %v394_v50 = vpack.c.bf16 %v156_v48, %v155_v47 }
  0x43   :  { %357 = vmatprep.subr.bf16.mxu0 %v504_v0 }
  0x44   :  { %380 = vmatpush3.bf16.msra.mxu1 %v379_v24 }
  0x45   :  { %381 = vmatprep.subr.bf16.mxu1 %v504_v0 }
  0x46   :  { %359 = vmatpush3.bf16.msra.mxu0 %v358_v21 }
  0x47   :  { %360 = vmatprep.subr.bf16.mxu0 %v504_v0 }
  0x48   :  { %383 = vmatpush3.bf16.msra.mxu1 %v382_v30 }
  0x49   :  { %384 = vmatprep.subr.bf16.mxu1 %v504_v0 }
  0x4a   :  { %362 = vmatpush3.bf16.msra.mxu0 %v361_v27 }
  0x4b   :  { %363 = vmatprep.subr.bf16.mxu0 %v504_v0 }
  0x4c   :  { %386 = vmatpush3.bf16.msra.mxu1 %v385_v36 }
  0x4d   :  { %387 = vmatprep.subr.bf16.mxu1 %v504_v0 }
  0x4e   :  { %365 = vmatpush3.bf16.msra.mxu0 %v364_v33 }
  0x4f   :  { %366 = vmatprep.subr.bf16.mxu0 %v504_v0 }
  0x50   :  { %389 = vmatpush3.bf16.msra.mxu1 %v388_v42 }
  0x51   :  { %390 = vmatprep.subr.bf16.mxu1 %v504_v0 }
  0x52   :  { %368 = vmatpush3.bf16.msra.mxu0 %v367_v39 }
  0x53   :  { %369 = vmatprep.subr.bf16.mxu0 %v504_v0 }
  0x54   :  { %392 = vmatpush3.bf16.msra.mxu1 %v391_v46 }
  0x55   :  { %393 = vmatprep.subr.bf16.mxu1 %v504_v0 }
  0x56   :  { %371 = vmatpush3.bf16.msra.mxu0 %v370_v45 }
  0x58   :  { %395 = vmatpush3.bf16.msra.mxu1 %v394_v50 }
  0x59   :  { %311 = vmatmul.mubr.f32.vlgmr.msra.gmra.mrb[0].mxu0 %v54_v49 }
 0x12c   :  { %v137_v51 = vpop.f32.mrb[0].mxu0 }
 0x12d   :  { %v312_v52 = vpop.f32.mrb[1].mxu0  ;;  %346 = vmatmul.mubr.f32.vlgmr.msra.gmra.mrb[0].mxu1 %v137_v51 }
 0x200   :  { %v223_v53 = vpop.f32.mrb[0].mxu1 }
 0x201   :  { %227 = vst [vmem:[#allocation8] sm:$0xff] %v223_v53  ;;  %v347_v54 = vpop.f32.mrb[1].mxu1 }
 0x202   :  { %482 = shalt.err (!%p479_p0)
}
 0x203   :  { %s483_s25 = scalar_lea.hbm %s601_s3, 128 }
 0x204   :  { %p484_p1 = scmp.ne.s32.totalorder %s601_s3, %s483_s25  ;;  %p487_p2 = scmp.lt.u32.totalorder %s483_s25, %s601_s3 }
 0x206   :  { %p489_p3 = pnand %p487_p2, %p484_p1 }
 0x208   :  { %492 = shalt.err (!%p489_p3)
}
 0x209   :  { %237 = dma.vmem_to_hbm [thread:$0]  %s235_s21, 128, %s601_s3, [#allocation4]  }
 0x20a   :  { %497 = dma.done.wait [#allocation4], 128  }
 0x20b   :  { %498 = vsyncadd [#allocation4], 4294967168 }
 0x20c   :  { %241 = vsyncpa [#allocation3], 1 }
 0x20d   :  { %242 = vsyncpa [#allocation6], 1 }
 0x20e   :  { %243 = vsyncpa [#allocation4], 1 }

</bundles_post_ra>
